<compile_context>
chip_gen: v7x
topology: tpu7x:2x2x1
jax: 0.10.0
libtpu: 0.0.40
codegen_flags: <defaults>
</compile_context>

<pallas_src>
import functools

import jax
import jax.numpy as jnp
from jax.experimental import pallas as pl
from jax.experimental.pallas import tpu as pltpu

_LANE = 128                       # TPU lane width / MXU dimension granule
_COMPUTE_DTYPE = jnp.bfloat16     # MXU operand dtype (f32 accumulation)
_VMEM_SLACK = 4 << 20             # compiler scratch headroom


def _round_up(n: int, m: int) -> int:
    return (n + m - 1) // m * m


def _vmem_budget_bytes() -> int:
    """Generation-aware scoped-VMEM cap: ~100 MiB on 128 MiB parts (v5e/v6e),
    ~50 MiB under v7x's 64 MiB physical VMEM."""
    try:
        cap = int(pltpu.get_tpu_info().vmem_capacity_bytes)
    except Exception:
        cap = 64 << 20            # conservative fallback (v7x-sized)
    return (cap * 25) // 32


def _pick_tile_b(b: int, in_p: int, budget: int) -> int:
    if b <= 128:
        # Small batch: don't stream mostly-zero LHS rows through the MXU.
        return max(8, _round_up(b, 16))
    # Large batch: bigger M tiles amortize per-grid-step overhead; keep >=2
    # grid steps so "parallel" can shard across v7x's two TensorCores, and
    # keep the double-buffered f32 x tile within ~1/3 of the VMEM budget.
    for t in (512, 256):
        if b >= 2 * t and 2 * t * in_p * 4 <= budget // 3:
            return t
    return 128


def _pick_fc_in_k_tile(tile_b, in_p, hidden_p, c_p, other_resident_bytes, budget):
    """fc_in K tile: full in_p when everything fits resident, otherwise stream
    double-buffered (tk, hidden_p) bf16 weight slabs over a K grid axis."""
    fixed = (2 * tile_b * c_p * 4          # double-buffered out tile (f32)
             + tile_b * hidden_p * 4       # f32 accumulator scratch
             + other_resident_bytes + _VMEM_SLACK)

    def fits(tk, n_w_buf):
        x_bytes = 2 * tile_b * tk * 4      # double-buffered f32 x tile
        w_bytes = n_w_buf * tk * hidden_p * 2
        return fixed + x_bytes + w_bytes <= budget

    if fits(in_p, 1):
        return in_p
    for tk in (4096, 2048, 1024, 512, 256, 128):
        if tk < in_p and in_p % tk == 0 and fits(tk, 2):
            return tk
    # TODO(synk): if even a 128-wide K slab does not fit (huge hidden_dim or
    # tile_b), also stream the hidden/out weights instead of keeping them
    # resident.
    return _LANE


def _mlp_deep_kernel(*refs, num_hidden_layers: int):
    """Fused MLP over one (batch tile, fc_in K slab) grid cell.

    refs = (x, w_in, b_in, [w_h_i, b_h_i]*num_hidden_layers, w_out, b_out,
            out, acc_scratch)
    x is (tile_b, tk) f32; weights are (in_pad, out_pad) bf16; biases are
    (1, out_pad) f32; out is (tile_b, classes_pad) f32; acc is (tile_b,
    hidden_pad) f32 and persists across the K grid axis.
    """
    x_ref = refs[0]
    o_ref = refs[-2]
    acc_ref = refs[-1]
    p = refs[1:-2]

    k = pl.program_id(1)

    @pl.when(k == 0)
    def _():
        acc_ref[...] = jnp.zeros_like(acc_ref)

    # fc_in partial product for this K slab: cast the f32 tile to bf16 in-regs
    # (x stays f32 in HBM; zero-padded K rows of w_in make any padding inert).
    acc_ref[...] += jnp.dot(x_ref[...].astype(p[0].dtype), p[0][...],
                            preferred_element_type=jnp.float32)

    @pl.when(k == pl.num_programs(1) - 1)
    def _():
        # fc_in bias + ReLU (f32 epilogue)
        h = jnp.maximum(acc_ref[...] + p[1][...], 0.0)

        # hidden layers + ReLU (bf16 MXU operands, f32 accumulate)
        idx = 2
        for _ in range(num_hidden_layers):
            w, b = p[idx], p[idx + 1]
            idx += 2
            h = jnp.dot(h.astype(w.dtype), w[...],
                        preferred_element_type=jnp.float32)
            h = jnp.maximum(h + b[...], 0.0)

        # fc_out (no activation) -> lane-dense padded store
        w_out, b_out = p[idx], p[idx + 1]
        out = jnp.dot(h.astype(w_out.dtype), w_out[...],
                      preferred_element_type=jnp.float32) + b_out[...]
        o_ref[...] = out.astype(o_ref.dtype)


def prepare_params(params, compute_dtype=_COMPUTE_DTYPE):
    """Convert torch-convention params [(W:(out,in), b:(out,))] to the kernel
    layout ONCE (outside the forward): transpose to (in, out), zero-pad every
    feature dim to a multiple of 128, cast weights to bf16, biases to f32."""
    prepped = []
    for (W, bias) in params:
        out_f, in_f = W.shape
        in_p, out_p = _round_up(in_f, _LANE), _round_up(out_f, _LANE)
        Wt = jnp.zeros((in_p, out_p), compute_dtype)
        Wt = Wt.at[:in_f, :out_f].set(W.T.astype(compute_dtype))
        bp = jnp.zeros((1, out_p), jnp.float32)
        bp = bp.at[0, :out_f].set(bias.astype(jnp.float32))
        prepped.append((Wt, bp))
    return prepped


def mlp_classifier_deep_forward(x, prepped_params, *, num_classes):
    """x: (b, 3, H, W) float32. prepped_params: output of prepare_params."""
    b = x.shape[0]
    in_features = x.shape[1] * x.shape[2] * x.shape[3]
    x_flat = x.reshape(b, -1).astype(jnp.float32)   # matches torch x.view(b,-1)

    in_p = prepped_params[0][0].shape[0]            # padded 3*H*W (K)
    hidden_p = prepped_params[0][0].shape[1]        # padded hidden_dim
    c_p = prepped_params[-1][0].shape[1]            # padded num_classes

    budget = _vmem_budget_bytes()
    tile_b = _pick_tile_b(b, in_p, budget)
    b_p = _round_up(b, tile_b)

    # Pad only remainders (cheap, f32) — no full bf16 activation copy.
    pad_m, pad_k = b_p - b, in_p - in_features
    if pad_m or pad_k:
        x_flat = jnp.pad(x_flat, ((0, pad_m), (0, pad_k)))

    w_in, b_in = prepped_params[0]
    rest = prepped_params[1:]                       # hidden layers + fc_out
    other_resident = int(b_in.size) * 4 + sum(
        int(W.size) * W.dtype.itemsize + int(bb.size) * 4 for (W, bb) in rest)

    tk = _pick_fc_in_k_tile(tile_b, in_p, hidden_p, c_p, other_resident, budget)
    n_k = in_p // tk

    kernel_args = [x_flat, w_in, b_in]
    for (W, bb) in rest:
        kernel_args.append(W)
        kernel_args.append(bb)

    def _resident_spec(shape):
        # Constant block index -> fetched once; single buffer halves VMEM cost.
        return pl.BlockSpec(shape, lambda i, k: (0, 0),
                            pipeline_mode=pl.Buffered(1))

    in_specs = [pl.BlockSpec((tile_b, tk), lambda i, k: (i, k))]   # x marches
    if n_k == 1:
        in_specs.append(_resident_spec((in_p, hidden_p)))          # fc_in resident
    else:
        in_specs.append(pl.BlockSpec((tk, hidden_p), lambda i, k: (k, 0)))  # streamed
    in_specs.append(_resident_spec(b_in.shape))
    for (W, bb) in rest:
        in_specs.append(_resident_spec(W.shape))
        in_specs.append(_resident_spec(bb.shape))

    out_spec = pl.BlockSpec((tile_b, c_p), lambda i, k: (i, 0))

    kernel = functools.partial(_mlp_deep_kernel,
                               num_hidden_layers=len(rest) - 1)

    out_padded = pl.pallas_call(
        kernel,
        out_shape=jax.ShapeDtypeStruct((b_p, c_p), jnp.float32),
        grid_spec=pltpu.PrefetchScalarGridSpec(
            num_scalar_prefetch=0,
            grid=(b_p // tile_b, n_k),
            in_specs=in_specs,
            out_specs=out_spec,
            scratch_shapes=[pltpu.VMEM((tile_b, hidden_p), jnp.float32)],
        ),
        compiler_params=pltpu.CompilerParams(
            dimension_semantics=("parallel", "arbitrary"),
            vmem_limit_bytes=int(budget),
        ),
    )(*kernel_args)

    return out_padded[:b, :num_classes]


def init_params(key, h, w, hidden_dim, num_classes, num_layers):
    """Deterministic init matching the torch module's layer shapes
    (uniform(-1/sqrt(fan_in), 1/sqrt(fan_in)) like nn.Linear default)."""
    dims = [3 * h * w] + [hidden_dim] * num_layers + [num_classes]
    params = []
    for i in range(len(dims) - 1):
        fan_in, fan_out = dims[i], dims[i + 1]
        key, kw, kb = jax.random.split(key, 3)
        bound = 1.0 / jnp.sqrt(fan_in)
        W = jax.random.uniform(kw, (fan_out, fan_in), jnp.float32, -bound, bound)
        bias = jax.random.uniform(kb, (fan_out,), jnp.float32, -bound, bound)
        params.append((W, bias))
    return params


def _reference_forward(x, params, compute_dtype=jnp.float32):
    """Pure-JAX reference mirroring the torch forward; compute_dtype controls
    the matmul operand dtype (f32 accumulation), like the kernel."""
    b = x.shape[0]
    h = x.reshape(b, -1)
    n = len(params)
    for i, (W, bias) in enumerate(params):
        h = jnp.dot(h.astype(compute_dtype), W.T.astype(compute_dtype),
                    preferred_element_type=jnp.float32) + bias.astype(jnp.float32)
        if i < n - 1:
            h = jnp.maximum(h, 0.0)
    return h


if __name__ == "__main__":
    # Small shapes consistent with the module: (b, 3, H, W)
    batch, H, W = 2, 16, 16
    hidden_dim, num_classes, num_layers = 128, 6, 3

    key = jax.random.PRNGKey(0)
    key, kx = jax.random.split(key)
    x = jax.random.normal(kx, (batch, 3, H, W), jnp.float32)

    params = init_params(key, H, W, hidden_dim, num_classes, num_layers)
    prepped = prepare_params(params)          # once, outside the forward path

    fwd = jax.jit(functools.partial(mlp_classifier_deep_forward,
                                    num_classes=num_classes))
    logits = jax.block_until_ready(fwd(x, prepped))

    assert logits.shape == (batch, num_classes)

    # Tight check: reference with the same bf16-operand / f32-accumulate recipe.
    ref_bf16 = _reference_forward(x, params, compute_dtype=_COMPUTE_DTYPE)
    assert jnp.allclose(logits, ref_bf16, atol=1e-2, rtol=1e-2), "mismatch vs bf16 reference"

    # Loose sanity check vs the pure-f32 torch-equivalent math (bf16 rounding).
    ref_f32 = _reference_forward(x, params, compute_dtype=jnp.float32)
    assert jnp.allclose(logits, ref_f32, atol=5e-2, rtol=5e-2), "mismatch vs f32 reference"

    print("KERNEL_OK")
</pallas_src>

<mosaic_0001>
module attributes {stable_mosaic.version = 11 : i64} {
  func.func @_mlp_deep_kernel(%arg0: i32, %arg1: i32, %arg2: memref<16x768xf32, #tpu.memory_space<vmem>>, %arg3: memref<768x128xbf16, #tpu.memory_space<vmem>>, %arg4: memref<1x128xf32, #tpu.memory_space<vmem>>, %arg5: memref<128x128xbf16, #tpu.memory_space<vmem>>, %arg6: memref<1x128xf32, #tpu.memory_space<vmem>>, %arg7: memref<128x128xbf16, #tpu.memory_space<vmem>>, %arg8: memref<1x128xf32, #tpu.memory_space<vmem>>, %arg9: memref<128x128xbf16, #tpu.memory_space<vmem>>, %arg10: memref<1x128xf32, #tpu.memory_space<vmem>>, %arg11: memref<16x128xf32, #tpu.memory_space<vmem>>, %arg12: memref<16x128xf32, #tpu.memory_space<vmem>>) attributes {dimension_semantics = [#tpu.dimension_semantics<parallel>, #tpu.dimension_semantics<arbitrary>], iteration_bounds = array<i64: 1, 1>, scalar_prefetch = 0 : i64, scratch_operands = 1 : i64, tpu.core_type = #tpu.core_type<tc>, window_params = [{transform_indices = @transform_0, window_bounds = array<i64: 16, 768>}, {pipeline_mode = #tpu.pipeline_mode<synchronous>, transform_indices = @transform_1, window_bounds = array<i64: 768, 128>}, {pipeline_mode = #tpu.pipeline_mode<synchronous>, transform_indices = @transform_2, window_bounds = array<i64: 1, 128>}, {pipeline_mode = #tpu.pipeline_mode<synchronous>, transform_indices = @transform_3, window_bounds = array<i64: 128, 128>}, {pipeline_mode = #tpu.pipeline_mode<synchronous>, transform_indices = @transform_4, window_bounds = array<i64: 1, 128>}, {pipeline_mode = #tpu.pipeline_mode<synchronous>, transform_indices = @transform_5, window_bounds = array<i64: 128, 128>}, {pipeline_mode = #tpu.pipeline_mode<synchronous>, transform_indices = @transform_6, window_bounds = array<i64: 1, 128>}, {pipeline_mode = #tpu.pipeline_mode<synchronous>, transform_indices = @transform_7, window_bounds = array<i64: 128, 128>}, {pipeline_mode = #tpu.pipeline_mode<synchronous>, transform_indices = @transform_8, window_bounds = array<i64: 1, 128>}, {transform_indices = @transform_9, window_bounds = array<i64: 16, 128>}]} {
    %c0_i32 = arith.constant 0 : i32
    %0 = arith.cmpi eq, %arg1, %c0_i32 : i32
    %1 = arith.extui %0 : i1 to i32
    %c0_i32_0 = arith.constant 0 : i32
    %2 = arith.cmpi ne, %1, %c0_i32_0 : i32
    scf.if %2 {
      %cst_10 = arith.constant 0.000000e+00 : f32
      %13 = vector.broadcast %cst_10 : f32 to vector<16x128xf32>
      %c0_11 = arith.constant 0 : index
      %c0_12 = arith.constant 0 : index
      %14 = vector.load %arg12[%c0_11, %c0_12] : memref<16x128xf32, #tpu.memory_space<vmem>>, vector<16x128xf32>
      tpu.vector_store %arg12[%c0_11, %c0_12], %13 {strides = array<i32>} : memref<16x128xf32, #tpu.memory_space<vmem>>, vector<16x128xf32>,
    } else {
    }
    %c0 = arith.constant 0 : index
    %c0_1 = arith.constant 0 : index
    %3 = vector.load %arg12[%c0, %c0_1] : memref<16x128xf32, #tpu.memory_space<vmem>>, vector<16x128xf32>
    %c0_2 = arith.constant 0 : index
    %c0_3 = arith.constant 0 : index
    %4 = vector.load %arg2[%c0_2, %c0_3] : memref<16x768xf32, #tpu.memory_space<vmem>>, vector<16x768xf32>
    %5 = arith.truncf %4 : vector<16x768xf32> to vector<16x768xbf16>
    %c0_4 = arith.constant 0 : index
    %c0_5 = arith.constant 0 : index
    %6 = vector.load %arg3[%c0_4, %c0_5] : memref<768x128xbf16, #tpu.memory_space<vmem>>, vector<768x128xbf16>
    %cst = arith.constant dense<0.000000e+00> : vector<16x128xf32>
    %7 = tpu.matmul %5, %6, %cst {dimension_numbers = #tpu.dot_dimension_numbers<[1], [0], [0], [1], [0, 0, 1, 1], [], []>} : vector<16x768xbf16>, vector<768x128xbf16>, vector<16x128xf32> -> vector<16x128xf32>
    %8 = arith.addf %3, %7 : vector<16x128xf32>
    %c0_6 = arith.constant 0 : index
    %c0_7 = arith.constant 0 : index
    %9 = vector.load %arg12[%c0_6, %c0_7] : memref<16x128xf32, #tpu.memory_space<vmem>>, vector<16x128xf32>
    tpu.vector_store %arg12[%c0_6, %c0_7], %8 {strides = array<i32>} : memref<16x128xf32, #tpu.memory_space<vmem>>, vector<16x128xf32>,
    %c0_i32_8 = arith.constant 0 : i32
    %10 = arith.cmpi eq, %arg1, %c0_i32_8 : i32
    %11 = arith.extui %10 : i1 to i32
    %c0_i32_9 = arith.constant 0 : i32
    %12 = arith.cmpi ne, %11, %c0_i32_9 : i32
    scf.if %12 {
      %c0_10 = arith.constant 0 : index
      %c0_11 = arith.constant 0 : index
      %13 = vector.load %arg12[%c0_10, %c0_11] : memref<16x128xf32, #tpu.memory_space<vmem>>, vector<16x128xf32>
      %c0_12 = arith.constant 0 : index
      %c0_13 = arith.constant 0 : index
      %14 = vector.load %arg4[%c0_12, %c0_13] : memref<1x128xf32, #tpu.memory_space<vmem>>, vector<1x128xf32>
      %15 = vector.broadcast %14 : vector<1x128xf32> to vector<16x128xf32>
      %16 = arith.addf %13, %15 : vector<16x128xf32>
      %cst_14 = arith.constant 0.000000e+00 : f32
      %17 = vector.broadcast %cst_14 : f32 to vector<16x128xf32>
      %18 = arith.maximumf %16, %17 : vector<16x128xf32>
      %19 = arith.truncf %18 : vector<16x128xf32> to vector<16x128xbf16>
      %c0_15 = arith.constant 0 : index
      %c0_16 = arith.constant 0 : index
      %20 = vector.load %arg5[%c0_15, %c0_16] : memref<128x128xbf16, #tpu.memory_space<vmem>>, vector<128x128xbf16>
      %cst_17 = arith.constant dense<0.000000e+00> : vector<16x128xf32>
      %21 = tpu.matmul %19, %20, %cst_17 {dimension_numbers = #tpu.dot_dimension_numbers<[1], [0], [0], [1], [0, 0, 1, 1], [], []>} : vector<16x128xbf16>, vector<128x128xbf16>, vector<16x128xf32> -> vector<16x128xf32>
      %c0_18 = arith.constant 0 : index
      %c0_19 = arith.constant 0 : index
      %22 = vector.load %arg6[%c0_18, %c0_19] : memref<1x128xf32, #tpu.memory_space<vmem>>, vector<1x128xf32>
      %23 = vector.broadcast %22 : vector<1x128xf32> to vector<16x128xf32>
      %24 = arith.addf %21, %23 : vector<16x128xf32>
      %cst_20 = arith.constant 0.000000e+00 : f32
      %25 = vector.broadcast %cst_20 : f32 to vector<16x128xf32>
      %26 = arith.maximumf %24, %25 : vector<16x128xf32>
      %27 = arith.truncf %26 : vector<16x128xf32> to vector<16x128xbf16>
      %c0_21 = arith.constant 0 : index
      %c0_22 = arith.constant 0 : index
      %28 = vector.load %arg7[%c0_21, %c0_22] : memref<128x128xbf16, #tpu.memory_space<vmem>>, vector<128x128xbf16>
      %cst_23 = arith.constant dense<0.000000e+00> : vector<16x128xf32>
      %29 = tpu.matmul %27, %28, %cst_23 {dimension_numbers = #tpu.dot_dimension_numbers<[1], [0], [0], [1], [0, 0, 1, 1], [], []>} : vector<16x128xbf16>, vector<128x128xbf16>, vector<16x128xf32> -> vector<16x128xf32>
      %c0_24 = arith.constant 0 : index
      %c0_25 = arith.constant 0 : index
      %30 = vector.load %arg8[%c0_24, %c0_25] : memref<1x128xf32, #tpu.memory_space<vmem>>, vector<1x128xf32>
      %31 = vector.broadcast %30 : vector<1x128xf32> to vector<16x128xf32>
      %32 = arith.addf %29, %31 : vector<16x128xf32>
      %cst_26 = arith.constant 0.000000e+00 : f32
      %33 = vector.broadcast %cst_26 : f32 to vector<16x128xf32>
      %34 = arith.maximumf %32, %33 : vector<16x128xf32>
      %35 = arith.truncf %34 : vector<16x128xf32> to vector<16x128xbf16>
      %c0_27 = arith.constant 0 : index
      %c0_28 = arith.constant 0 : index
      %36 = vector.load %arg9[%c0_27, %c0_28] : memref<128x128xbf16, #tpu.memory_space<vmem>>, vector<128x128xbf16>
      %cst_29 = arith.constant dense<0.000000e+00> : vector<16x128xf32>
      %37 = tpu.matmul %35, %36, %cst_29 {dimension_numbers = #tpu.dot_dimension_numbers<[1], [0], [0], [1], [0, 0, 1, 1], [], []>} : vector<16x128xbf16>, vector<128x128xbf16>, vector<16x128xf32> -> vector<16x128xf32>
      %c0_30 = arith.constant 0 : index
      %c0_31 = arith.constant 0 : index
      %38 = vector.load %arg10[%c0_30, %c0_31] : memref<1x128xf32, #tpu.memory_space<vmem>>, vector<1x128xf32>
      %39 = vector.broadcast %38 : vector<1x128xf32> to vector<16x128xf32>
      %40 = arith.addf %37, %39 : vector<16x128xf32>
      %c0_32 = arith.constant 0 : index
      %c0_33 = arith.constant 0 : index
      %41 = vector.load %arg11[%c0_32, %c0_33] : memref<16x128xf32, #tpu.memory_space<vmem>>, vector<16x128xf32>
      tpu.vector_store %arg11[%c0_32, %c0_33], %40 {strides = array<i32>} : memref<16x128xf32, #tpu.memory_space<vmem>>, vector<16x128xf32>,
    } else {
    }
    return
  }
  func.func @transform_0(%arg0: i32, %arg1: i32) -> (i32, i32) {
    %c0_i32 = arith.constant 0 : i32
    return %arg0, %arg1 : i32, i32
  }
  func.func @transform_1(%arg0: i32, %arg1: i32) -> (i32, i32) {
    %c0_i32 = arith.constant 0 : i32
    %c0_i32_0 = arith.constant 0 : i32
    %c0_i32_1 = arith.constant 0 : i32
    return %c0_i32, %c0_i32_0 : i32, i32
  }
  func.func @transform_2(%arg0: i32, %arg1: i32) -> (i32, i32) {
    %c0_i32 = arith.constant 0 : i32
    %c0_i32_0 = arith.constant 0 : i32
    %c0_i32_1 = arith.constant 0 : i32
    return %c0_i32, %c0_i32_0 : i32, i32
  }
  func.func @transform_3(%arg0: i32, %arg1: i32) -> (i32, i32) {
    %c0_i32 = arith.constant 0 : i32
    %c0_i32_0 = arith.constant 0 : i32
    %c0_i32_1 = arith.constant 0 : i32
    return %c0_i32, %c0_i32_0 : i32, i32
  }
  func.func @transform_4(%arg0: i32, %arg1: i32) -> (i32, i32) {
    %c0_i32 = arith.constant 0 : i32
    %c0_i32_0 = arith.constant 0 : i32
    %c0_i32_1 = arith.constant 0 : i32
    return %c0_i32, %c0_i32_0 : i32, i32
  }
  func.func @transform_5(%arg0: i32, %arg1: i32) -> (i32, i32) {
    %c0_i32 = arith.constant 0 : i32
    %c0_i32_0 = arith.constant 0 : i32
    %c0_i32_1 = arith.constant 0 : i32
    return %c0_i32, %c0_i32_0 : i32, i32
  }
  func.func @transform_6(%arg0: i32, %arg1: i32) -> (i32, i32) {
    %c0_i32 = arith.constant 0 : i32
    %c0_i32_0 = arith.constant 0 : i32
    %c0_i32_1 = arith.constant 0 : i32
    return %c0_i32, %c0_i32_0 : i32, i32
  }
  func.func @transform_7(%arg0: i32, %arg1: i32) -> (i32, i32) {
    %c0_i32 = arith.constant 0 : i32
    %c0_i32_0 = arith.constant 0 : i32
    %c0_i32_1 = arith.constant 0 : i32
    return %c0_i32, %c0_i32_0 : i32, i32
  }
  func.func @transform_8(%arg0: i32, %arg1: i32) -> (i32, i32) {
    %c0_i32 = arith.constant 0 : i32
    %c0_i32_0 = arith.constant 0 : i32
    %c0_i32_1 = arith.constant 0 : i32
    return %c0_i32, %c0_i32_0 : i32, i32
  }
  func.func @transform_9(%arg0: i32, %arg1: i32) -> (i32, i32) {
    %c0_i32 = arith.constant 0 : i32
    %c0_i32_0 = arith.constant 0 : i32
    return %arg0, %c0_i32 : i32, i32
  }
}

</mosaic_0001>

<bundles_post_ra>
// kernel: mlp_classifier_deep_forward.1
= control target key start
LH: loop header
LB: loop body
LE: loop exit
PB: predicated region body
PF: predicated region fallthrough
CT: control target
= control target key end

     0   :  { %14 = vsyncpa [#allocation4], 0  ;;  %s1280_s30 = smov [#allocation3]   ;;  %s1503_s0 = inlined_call_operand.vmem [shape: f32[16,768], index: 0, kind: input, shape index: {}]   ;;  %s1504_s1 = inlined_call_operand.hbm [shape: bf16[768,128], index: 1, kind: input, shape index: {}]   ;;  %s1505_s2 = inlined_call_operand.vmem [shape: f32[1,128], index: 2, kind: input, shape index: {}]   ;;  %s1506_s3 = inlined_call_operand.vmem [shape: bf16[128,128], index: 3, kind: input, shape index: {}]   ;;  %s1507_s4 = inlined_call_operand.vmem [shape: f32[1,128], index: 4, kind: input, shape index: {}]   ;;  %s1508_s5 = inlined_call_operand.vmem [shape: bf16[128,128], index: 5, kind: input, shape index: {}]   ;;  %s1509_s6 = inlined_call_operand.vmem [shape: f32[1,128], index: 6, kind: input, shape index: {}]   ;;  %s1510_s7 = inlined_call_operand.vmem [shape: bf16[128,128], index: 7, kind: input, shape index: {}]   ;;  %s1511_s8 = inlined_call_operand.vmem [shape: f32[1,128], index: 8, kind: input, shape index: {}]   ;;  %s1512_s9 = inlined_call_operand.vmem [shape: f32[16,128], index: 9, kind: output, shape index: {}]  }
   0x1   :  { %s22_s10 = sshll.u32 %s1280_s30, 4  ;;  %s1256_s13 = scalar_lea.hbm %s1504_s1, 6144  ;;  %s23_s10 = int_to_ptr.vmem [resolvable:$true] %s22_s10 }
   0x2   :  { %p1257_p0 = scmp.ne.s32.totalorder %s1504_s1, %s1256_s13  ;;  %p1260_p1 = scmp.lt.u32.totalorder %s1256_s13, %s1504_s1 }
   0x4   :  { %p1262_p2 = pnand %p1260_p1, %p1257_p0 }
   0x6   :  { %1265 = shalt.err (!%p1262_p2)
}
   0x7   :  { %s1266_s18 = scalar_lea.vmem %s23_s10, 6144  ;;  %p1271_p4 = scmp.lt.s32.totalorder %s23_s10, %s23_s10 }
   0x8   :  { %p1267_p3 = scmp.ne.s32.totalorder %s23_s10, %s1266_s18  ;;  %p1272_p5 = scmp.lt.s32.totalorder %s1266_s18, %s1266_s18 }
   0xa   :  { %p1273_p6 = por %p1272_p5, %p1271_p4 }
   0xc   :  { %p1274_p7 = pnand %p1273_p6, %p1267_p3 }
   0xe   :  { %1277 = shalt.err (!%p1274_p7)
}
   0xf   :  { %s1281_s19 = smov 64   ;;  %s1282_s20 = smov 4  }
  0x10   :  { %28 = dma.hbm_to_vmem [thread:$0]  %s1504_s1, 6144, %s23_s10, [#allocation4], %s1281_s19, %s1281_s19, %s1282_s20  }
  0x11   :  { %1278 = dma.done.wait [#allocation4], 6144  }
  0x12   :  { %1279 = vsyncadd [#allocation4], 4294961152  ;;  %v1184_v0 = vld [vmem:[#allocation3 + $0x40] sm:$0xff]   ;;  %v1188_v4 = vld [vmem:[#allocation3 + $0x48] sm:$0xff]   ;;  %vm1284_vm0 = vmmov 0  }
  0x13   :  { %v1185_v1 = vld [vmem:[#allocation3 + $0xc0] sm:$0xff]   ;;  %1026 = vmatprep.subr.bf16.mxu0 %v1184_v0  ;;  %v1189_v5 = vld [vmem:[#allocation3 + $0xc8] sm:$0xff]   ;;  %v1192_v8 = vld [vmem:[#allocation3 + $0x50] sm:$0xff]  }
  0x14   :  { %v1186_v2 = vld [vmem:[#allocation3] sm:$0xff]   ;;  %1048 = vmatprep.subr.bf16.mxu1 %v1185_v1  ;;  %v1190_v6 = vld [vmem:[#allocation3 + $0x8] sm:$0xff]   ;;  %v1193_v9 = vld [vmem:[#allocation3 + $0xd0] sm:$0xff]  }
  0x15   :  { %v1187_v3 = vld [vmem:[#allocation3 + $0x80] sm:$0xff]   ;;  %1027 = vmatpush3.bf16.msra.mxu0 %v1186_v2  ;;  %v1191_v7 = vld [vmem:[#allocation3 + $0x88] sm:$0xff]   ;;  %v1194_v10 = vld [vmem:[#allocation3 + $0x10] sm:$0xff]  }
  0x16   :  { %1049 = vmatpush3.bf16.msra.mxu1 %v1187_v3  ;;  %1028 = vmatprep.subr.bf16.mxu0 %v1188_v4  ;;  %v1195_v11 = vld [vmem:[#allocation3 + $0x90] sm:$0xff]   ;;  %v1196_v12 = vld [vmem:[#allocation3 + $0x58] sm:$0xff]   ;;  %v1200_v16 = vld [vmem:[#allocation3 + $0x60] sm:$0xff]   ;;  %v1283_v3 = vmov 0.0  }
  0x17   :  { %1050 = vmatprep.subr.bf16.mxu1 %v1189_v5  ;;  %v1197_v13 = vld [vmem:[#allocation3 + $0xd8] sm:$0xff]   ;;  %v1201_v17 = vld [vmem:[#allocation3 + $0xe0] sm:$0xff]   ;;  %v1204_v20 = vld [vmem:[#allocation3 + $0x68] sm:$0xff]  }
  0x18   :  { %v1198_v14 = vld [vmem:[#allocation3 + $0x18] sm:$0xff]   ;;  %v1202_v18 = vld [vmem:[#allocation3 + $0x20] sm:$0xff]   ;;  %v1205_v21 = vld [vmem:[#allocation3 + $0xe8] sm:$0xff]  }
  0x19   :  { %1029 = vmatpush3.bf16.msra.mxu0 %v1190_v6  ;;  %v1199_v15 = vld [vmem:[#allocation3 + $0x98] sm:$0xff]   ;;  %v1203_v19 = vld [vmem:[#allocation3 + $0xa0] sm:$0xff]   ;;  %v1206_v22 = vld [vmem:[#allocation3 + $0x28] sm:$0xff]  }
  0x1a   :  { %1051 = vmatpush3.bf16.msra.mxu1 %v1191_v7  ;;  %1030 = vmatprep.subr.bf16.mxu0 %v1192_v8  ;;  %v1207_v23 = vld [vmem:[#allocation3 + $0xa8] sm:$0xff]   ;;  %v1208_v24 = vld [vmem:[#allocation3 + $0x70] sm:$0xff]   ;;  %v1212_v28 = vld [vmem:[#allocation3 + $0x78] sm:$0xff]  }
  0x1b   :  { %1052 = vmatprep.subr.bf16.mxu1 %v1193_v9  ;;  %v1209_v25 = vld [vmem:[#allocation3 + $0xf0] sm:$0xff]   ;;  %v1213_v29 = vld [vmem:[#allocation3 + $0xf8] sm:$0xff]   ;;  %v56_v32 = vld [vmem:[%s1503_s0 + $0x8] sm:$0xff] }
  0x1c   :  { %v1210_v26 = vld [vmem:[#allocation3 + $0x30] sm:$0xff]   ;;  %v1214_v30 = vld [vmem:[#allocation3 + $0x38] sm:$0xff]   ;;  %v64_v36 = vld [vmem:[%s1503_s0 + $0x48] sm:$0xff] }
  0x1d   :  { %1031 = vmatpush3.bf16.msra.mxu0 %v1194_v10  ;;  %v1211_v27 = vld [vmem:[#allocation3 + $0xb0] sm:$0xff]   ;;  %v1215_v31 = vld [vmem:[#allocation3 + $0xb8] sm:$0xff]   ;;  %v55_v37 = vld [vmem:[%s1503_s0] sm:$0xff] }
  0x1e   :  { %1053 = vmatpush3.bf16.msra.mxu1 %v1195_v11  ;;  %1032 = vmatprep.subr.bf16.mxu0 %v1196_v12  ;;  %v62_v33 = vld [vmem:[%s1503_s0 + $0x38] sm:$0xff]  ;;  %v61_v38 = vld [vmem:[%s1503_s0 + $0x30] sm:$0xff]  ;;  %v63_v42 = vld [vmem:[%s1503_s0 + $0x40] sm:$0xff] }
  0x1f   :  { %1054 = vmatprep.subr.bf16.mxu1 %v1197_v13  ;;  %v58_v34 = vld [vmem:[%s1503_s0 + $0x18] sm:$0xff]  ;;  %v68_v35 = vpack.c.bf16 %v62_v33, %v56_v32  ;;  %v67_v40 = vpack.c.bf16 %v61_v38, %v55_v37  ;;  %v57_v41 = vld [vmem:[%s1503_s0 + $0x10] sm:$0xff]  ;;  %v1216_v44 = vld [vmem:[#allocation3 + $0x140] sm:$0xff]  }
  0x20   :  { %v70_v39 = vpack.c.bf16 %v64_v36, %v58_v34  ;;  %v69_v43 = vpack.c.bf16 %v63_v42, %v57_v41  ;;  %v1217_v45 = vld [vmem:[#allocation3 + $0x100] sm:$0xff]   ;;  %v1218_v46 = vld [vmem:[#allocation3 + $0x148] sm:$0xff]   ;;  %v1220_v48 = vld [vmem:[#allocation3 + $0x150] sm:$0xff]  }
  0x21   :  { %1033 = vmatpush3.bf16.msra.mxu0 %v1198_v14  ;;  %489 = vmatprep.mubr.bf16.mxu0 %v68_v35  ;;  %v1219_v47 = vld [vmem:[#allocation3 + $0x108] sm:$0xff]   ;;  %v1221_v49 = vld [vmem:[#allocation3 + $0x110] sm:$0xff]   ;;  %v1222_v50 = vld [vmem:[#allocation3 + $0x158] sm:$0xff]  }
  0x22   :  { %1055 = vmatpush3.bf16.msra.mxu1 %v1199_v15  ;;  %1034 = vmatprep.subr.bf16.mxu0 %v1200_v16  ;;  %v1223_v51 = vld [vmem:[#allocation3 + $0x118] sm:$0xff]   ;;  %v1224_v52 = vld [vmem:[#allocation3 + $0x160] sm:$0xff]   ;;  %v60_v54 = vld [vmem:[%s1503_s0 + $0x28] sm:$0xff] }
  0x23   :  { %1056 = vmatprep.subr.bf16.mxu1 %v1201_v17  ;;  %530 = vmatprep.mubr.bf16.mxu1 %v70_v39  ;;  %v1225_v53 = vld [vmem:[#allocation3 + $0x120] sm:$0xff]   ;;  %v1226_v55 = vld [vmem:[#allocation3 + $0x168] sm:$0xff]   ;;  %v66_v56 = vld [vmem:[%s1503_s0 + $0x58] sm:$0xff] }
  0x24   :  { %v1227_v57 = vld [vmem:[#allocation3 + $0x128] sm:$0xff]   ;;  %v72_v58 = vpack.c.bf16 %v66_v56, %v60_v54  ;;  %v1228_v59 = vld [vmem:[#allocation3 + $0x170] sm:$0xff]   ;;  %v1230_v61 = vld [vmem:[#allocation3 + $0x178] sm:$0xff]  }
  0x25   :  { %1035 = vmatpush3.bf16.msra.mxu0 %v1202_v18  ;;  %v1229_v60 = vld [vmem:[#allocation3 + $0x130] sm:$0xff]   ;;  %v1231_v62 = vld [vmem:[#allocation3 + $0x138] sm:$0xff]   ;;  %v59_v63 = vld [vmem:[%s1503_s0 + $0x20] sm:$0xff] }
  0x26   :  { %1057 = vmatpush3.bf16.msra.mxu1 %v1203_v19  ;;  %1036 = vmatprep.subr.bf16.mxu0 %v1204_v20  ;;  %v65_v0 = vld [vmem:[%s1503_s0 + $0x50] sm:$0xff]  ;;  %v1232_v2 = vld [vmem:[%s1506_s3] sm:$0xff]   ;;  %v1233_v4 = vld [vmem:[%s1506_s3 + $0x8] sm:$0xff]  }
  0x27   :  { %1058 = vmatprep.subr.bf16.mxu1 %v1205_v21  ;;  %v71_v1 = vpack.c.bf16 %v65_v0, %v59_v63  ;;  %v1234_v5 = vld [vmem:[%s1506_s3 + $0x10] sm:$0xff]   ;;  %v1235_v6 = vld [vmem:[%s1506_s3 + $0x18] sm:$0xff]   ;;  %v1236_v7 = vld [vmem:[%s1506_s3 + $0x20] sm:$0xff]  }
  0x28   :  { %v1237_v8 = vld [vmem:[%s1506_s3 + $0x28] sm:$0xff]   ;;  %v1238_v9 = vld [vmem:[%s1506_s3 + $0x30] sm:$0xff]   ;;  %v1239_v10 = vld [vmem:[%s1506_s3 + $0x38] sm:$0xff]  }
  0x29   :  { %1037 = vmatpush3.bf16.msra.mxu0 %v1206_v22  ;;  %v1240_v11 = vld [vmem:[%s1508_s5] sm:$0xff]   ;;  %v1241_v12 = vld [vmem:[%s1508_s5 + $0x8] sm:$0xff]   ;;  %v1242_v13 = vld [vmem:[%s1508_s5 + $0x10] sm:$0xff]  }
  0x2a   :  { %1059 = vmatpush3.bf16.msra.mxu1 %v1207_v23  ;;  %1038 = vmatprep.subr.bf16.mxu0 %v1208_v24  ;;  %v1243_v14 = vld [vmem:[%s1508_s5 + $0x18] sm:$0xff]   ;;  %v1244_v15 = vld [vmem:[%s1508_s5 + $0x20] sm:$0xff]   ;;  %v1245_v16 = vld [vmem:[%s1508_s5 + $0x28] sm:$0xff]  }
  0x2b   :  { %1060 = vmatprep.subr.bf16.mxu1 %v1209_v25  ;;  %v998_v35 = vld [vmem:[%s1505_s2] ss:$0 sm:$0xff]  ;;  %v1254_v63 = vld [vmem:[%s1510_s7 + $0x30] sm:$0xff]   ;;  %v1255_v0 = vld [vmem:[%s1510_s7 + $0x38] sm:$0xff]  }
  0x2d   :  { %1039 = vmatpush3.bf16.msra.mxu0 %v1210_v26 }
  0x2e   :  { %1061 = vmatpush3.bf16.msra.mxu1 %v1211_v27  ;;  %1040 = vmatprep.subr.bf16.mxu0 %v1212_v28 }
  0x2f   :  { %1062 = vmatprep.subr.bf16.mxu1 %v1213_v29 }
  0x31   :  { %1041 = vmatpush3.bf16.msra.mxu0 %v1214_v30 }
  0x32   :  { %1063 = vmatpush3.bf16.msra.mxu1 %v1215_v31  ;;  %1070 = vmatprep.subr.bf16.mxu0 %v1216_v44 }
  0x33   :  { %1119 = vmatprep.subr.bf16.mxu1 %v1283_v3 }
  0x34   :  { %490 = vmatmul.mubr.bf16.vlgmr.msra.gmra.mrb[0].mxu0 %v67_v40 }
  0x35   :  { %531 = vmatmul.mubr.bf16.vlgmr.msra.gmra.mrb[0].mxu1 %v69_v43  ;;  %1071 = vmatpush3.bf16.msra.mxu0 %v1217_v45  ;;  %v1246_v45 = vld [vmem:[%s1508_s5 + $0x30] sm:$0xff]  }
  0x36   :  { %1072 = vmatprep.subr.bf16.mxu0 %v1218_v46  ;;  %571 = vmatprep.mubr.bf16.mxu0 %v72_v58  ;;  %v1247_v46 = vld [vmem:[%s1508_s5 + $0x38] sm:$0xff]  }
  0x37   :  { %1120 = vmatpush3.bf16.msra.mxu1 %v1232_v2  ;;  %1135 = vmatprep.mubr.msk.bf16.mxu1 %vm1284_vm0, %v1283_v3 }
  0x38   :  { %1121 = vmatprep.subr.bf16.mxu1 %v1283_v3 }
  0x39   :  { %1073 = vmatpush3.bf16.msra.mxu0 %v1219_v47  ;;  %v1248_v47 = vld [vmem:[%s1510_s7] sm:$0xff]  }
  0x3a   :  { %1074 = vmatprep.subr.bf16.mxu0 %v1220_v48  ;;  %v1249_v48 = vld [vmem:[%s1510_s7 + $0x8] sm:$0xff]  }
  0x3b   :  { %1122 = vmatpush3.bf16.msra.mxu1 %v1233_v4 }
  0x3c   :  { %1123 = vmatprep.subr.bf16.mxu1 %v1283_v3 }
  0x3d   :  { %1075 = vmatpush3.bf16.msra.mxu0 %v1221_v49  ;;  %v1250_v49 = vld [vmem:[%s1510_s7 + $0x10] sm:$0xff]  }
  0x3e   :  { %1076 = vmatprep.subr.bf16.mxu0 %v1222_v50  ;;  %v1251_v50 = vld [vmem:[%s1510_s7 + $0x18] sm:$0xff]  }
  0x3f   :  { %1124 = vmatpush3.bf16.msra.mxu1 %v1234_v5 }
  0x40   :  { %1125 = vmatprep.subr.bf16.mxu1 %v1283_v3 }
  0x41   :  { %1077 = vmatpush3.bf16.msra.mxu0 %v1223_v51  ;;  %v1252_v51 = vld [vmem:[%s1510_s7 + $0x20] sm:$0xff]  }
  0x42   :  { %1078 = vmatprep.subr.bf16.mxu0 %v1224_v52  ;;  %v1253_v52 = vld [vmem:[%s1510_s7 + $0x28] sm:$0xff]  }
  0x43   :  { %1126 = vmatpush3.bf16.msra.mxu1 %v1235_v6 }
  0x44   :  { %1127 = vmatprep.subr.bf16.mxu1 %v1283_v3 }
  0x45   :  { %1079 = vmatpush3.bf16.msra.mxu0 %v1225_v53  ;;  %v999_v53 = vld [vmem:[%s1507_s4] ss:$0 sm:$0xff] }
  0x46   :  { %1080 = vmatprep.subr.bf16.mxu0 %v1226_v55 }
  0x47   :  { %1128 = vmatpush3.bf16.msra.mxu1 %v1236_v7 }
  0x48   :  { %1129 = vmatprep.subr.bf16.mxu1 %v1283_v3 }
  0x49   :  { %1081 = vmatpush3.bf16.msra.mxu0 %v1227_v57 }
  0x4a   :  { %1082 = vmatprep.subr.bf16.mxu0 %v1228_v59 }
  0x4b   :  { %1130 = vmatpush3.bf16.msra.mxu1 %v1237_v8 }
  0x4c   :  { %1131 = vmatprep.subr.bf16.mxu1 %v1283_v3 }
  0x4d   :  { %1083 = vmatpush3.bf16.msra.mxu0 %v1229_v60 }
  0x4e   :  { %1084 = vmatprep.subr.bf16.mxu0 %v1230_v61 }
  0x4f   :  { %1132 = vmatpush3.bf16.msra.mxu1 %v1238_v9 }
  0x50   :  { %1133 = vmatprep.subr.bf16.mxu1 %v1283_v3 }
  0x51   :  { %1085 = vmatpush3.bf16.msra.mxu0 %v1231_v62 }
  0x52   :  { %1139 = vmatprep.subr.bf16.mxu0 %v1283_v3 }
  0x53   :  { %1134 = vmatpush3.bf16.msra.mxu1 %v1239_v10 }
  0x54   :  { %572 = vmatmul.mubr.bf16.vlgmr.msra.gmra.mrb[4].mxu0 %v71_v1  ;;  %1159 = vmatprep.subr.bf16.mxu1 %v1283_v3  ;;  %v1008_v1 = vld [vmem:[%s1509_s6] ss:$0 sm:$0xff] }
  0x55   :  { %1155 = vmatprep.mubr.msk.bf16.mxu0 %vm1284_vm0, %v1283_v3  ;;  %1140 = vmatpush3.bf16.msra.mxu0 %v1240_v11 }
  0x56   :  { %1141 = vmatprep.subr.bf16.mxu0 %v1283_v3 }
  0x59   :  { %1142 = vmatpush3.bf16.msra.mxu0 %v1241_v12 }
  0x5a   :  { %1143 = vmatprep.subr.bf16.mxu0 %v1283_v3 }
  0x5d   :  { %1144 = vmatpush3.bf16.msra.mxu0 %v1242_v13 }
  0x5e   :  { %1145 = vmatprep.subr.bf16.mxu0 %v1283_v3 }
  0x61   :  { %1146 = vmatpush3.bf16.msra.mxu0 %v1243_v14 }
  0x62   :  { %1147 = vmatprep.subr.bf16.mxu0 %v1283_v3 }
  0x65   :  { %1148 = vmatpush3.bf16.msra.mxu0 %v1244_v15 }
  0x66   :  { %1149 = vmatprep.subr.bf16.mxu0 %v1283_v3 }
  0x69   :  { %1150 = vmatpush3.bf16.msra.mxu0 %v1245_v16 }
  0x6a   :  { %1151 = vmatprep.subr.bf16.mxu0 %v1283_v3 }
  0x6d   :  { %1152 = vmatpush3.bf16.msra.mxu0 %v1246_v45 }
  0x6e   :  { %1153 = vmatprep.subr.bf16.mxu0 %v1283_v3 }
  0x71   :  { %1154 = vmatpush3.bf16.msra.mxu0 %v1247_v46 }
 0x107   :  { %v1042_v17 = vpop.f32.mrb[0].mxu0 }
 0x108   :  { %v1064_v18 = vpop.f32.mrb[0].mxu1  ;;  %v1043_v19 = vpop.f32.mrb[1].mxu0 }
 0x109   :  { %v1044_v20 = vadd.f32 %v1043_v19, %v1042_v17  ;;  %v1065_v21 = vpop.f32.mrb[1].mxu1  ;;  %v1045_v22 = vpop.f32.mrb[2].mxu0 }
 0x10a   :  { %v1066_v23 = vadd.f32 %v1065_v21, %v1064_v18  ;;  %v1067_v24 = vpop.f32.mrb[2].mxu1  ;;  %v1046_v25 = vpop.f32.mrb[3].mxu0 }
 0x10b   :  { %v1047_v26 = vadd.f32 %v1046_v25, %v1045_v22  ;;  %v1068_v27 = vpop.f32.mrb[3].mxu1 }
 0x10c   :  { %v533_v28 = vadd.f32 %v1066_v23, %v1044_v20  ;;  %v1069_v29 = vadd.f32 %v1068_v27, %v1067_v24 }
 0x10e   :  { %v536_v30 = vadd.f32 %v1069_v29, %v1047_v26 }
 0x127   :  { %v1086_v31 = vpop.f32.mrb[4].mxu0 }
 0x128   :  { %v1087_v32 = vpop.f32.mrb[5].mxu0 }
 0x129   :  { %v1088_v33 = vadd.f32 %v1087_v32, %v1086_v31  ;;  %v1089_v34 = vpop.f32.mrb[6].mxu0 }
 0x12a   :  { %v1090_v36 = vpop.f32.mrb[7].mxu0 }
 0x12b   :  { %v574_v37 = vadd.f32 %v1088_v33, %v533_v28  ;;  %v1091_v38 = vadd.f32 %v1090_v36, %v1089_v34 }
 0x12d   :  { %v596_v39 = vadd.f32 %v998_v35, %v574_v37  ;;  %v577_v40 = vadd.f32 %v1091_v38, %v536_v30 }
 0x12f   :  { %v597_v41 = vadd.f32 %v998_v35, %v577_v40  ;;  %v598_v42 = vmax.f32 %v596_v39, 0.0 }
 0x131   :  { %v599_v43 = vmax.f32 %v597_v41, 0.0 }
 0x133   :  { %v600_v44 = vpack.c.bf16 %v599_v43, %v598_v42 }
 0x135   :  { %1136 = vmatmul.mubr.bf16.vlgmr.msra.gmra.mrb[4].mxu1 %v600_v44 }
 0x136   :  { %1175 = vmatprep.mubr.msk.bf16.mxu1 %vm1284_vm0, %v1283_v3  ;;  %1160 = vmatpush3.bf16.msra.mxu1 %v1248_v47 }
 0x137   :  { %1161 = vmatprep.subr.bf16.mxu1 %v1283_v3 }
 0x13a   :  { %1162 = vmatpush3.bf16.msra.mxu1 %v1249_v48 }
 0x13b   :  { %1163 = vmatprep.subr.bf16.mxu1 %v1283_v3 }
 0x13e   :  { %1164 = vmatpush3.bf16.msra.mxu1 %v1250_v49 }
 0x13f   :  { %1165 = vmatprep.subr.bf16.mxu1 %v1283_v3 }
 0x142   :  { %1166 = vmatpush3.bf16.msra.mxu1 %v1251_v50 }
 0x143   :  { %1167 = vmatprep.subr.bf16.mxu1 %v1283_v3 }
 0x146   :  { %1168 = vmatpush3.bf16.msra.mxu1 %v1252_v51 }
 0x147   :  { %1169 = vmatprep.subr.bf16.mxu1 %v1283_v3 }
 0x14a   :  { %1170 = vmatpush3.bf16.msra.mxu1 %v1253_v52 }
 0x14b   :  { %1171 = vmatprep.subr.bf16.mxu1 %v1283_v3 }
 0x14e   :  { %1172 = vmatpush3.bf16.msra.mxu1 %v1254_v63 }
 0x14f   :  { %1173 = vmatprep.subr.bf16.mxu1 %v1283_v3  ;;  %v1017_v3 = vld [vmem:[%s1511_s8] ss:$0 sm:$0xff] }
 0x152   :  { %1174 = vmatpush3.bf16.msra.mxu1 %v1255_v0 }
 0x208   :  { %v706_v54 = vpop.f32.mrb[4].mxu1 }
 0x209   :  { %v707_v55 = vadd.f32 %v999_v53, %v706_v54  ;;  %v1137_v56 = vpop.f32.mrb[5].mxu1 }
 0x20a   :  { %v709_v57 = vpop.f32.mrb[6].mxu1 }
 0x20b   :  { %v710_v58 = vadd.f32 %v999_v53, %v709_v57  ;;  %v1138_v59 = vpop.f32.mrb[7].mxu1  ;;  %v713_v60 = vmax.f32 %v707_v55, 0.0 }
 0x20d   :  { %v714_v61 = vmax.f32 %v710_v58, 0.0 }
 0x20f   :  { %v715_v62 = vpack.c.bf16 %v714_v61, %v713_v60 }
 0x211   :  { %1156 = vmatmul.mubr.bf16.vlgmr.msra.gmra.mrb[8].mxu0 %v715_v62 }
 0x2e4   :  { %v821_v2 = vpop.f32.mrb[8].mxu0 }
 0x2e5   :  { %v822_v4 = vadd.f32 %v1008_v1, %v821_v2  ;;  %v1157_v5 = vpop.f32.mrb[9].mxu0 }
 0x2e6   :  { %v824_v6 = vpop.f32.mrb[10].mxu0 }
 0x2e7   :  { %v825_v7 = vadd.f32 %v1008_v1, %v824_v6  ;;  %v1158_v8 = vpop.f32.mrb[11].mxu0  ;;  %v828_v9 = vmax.f32 %v822_v4, 0.0 }
 0x2e9   :  { %v829_v10 = vmax.f32 %v825_v7, 0.0 }
 0x2eb   :  { %v830_v11 = vpack.c.bf16 %v829_v10, %v828_v9 }
 0x2ed   :  { %1176 = vmatmul.mubr.bf16.vlgmr.msra.gmra.mrb[8].mxu1 %v830_v11 }
 0x3c0   :  { %v936_v12 = vpop.f32.mrb[8].mxu1 }
 0x3c1   :  { %v937_v13 = vadd.f32 %v1017_v3, %v936_v12  ;;  %v1177_v14 = vpop.f32.mrb[9].mxu1 }
 0x3c2   :  { %v939_v15 = vpop.f32.mrb[10].mxu1 }
 0x3c3   :  { %943 = vst [vmem:[%s1512_s9] sm:$0xff] %v937_v13  ;;  %v940_v16 = vadd.f32 %v1017_v3, %v939_v15  ;;  %v1178_v17 = vpop.f32.mrb[11].mxu1 }
 0x3c5   :  { %944 = vst [vmem:[%s1512_s9 + $0x8] sm:$0xff] %v940_v16 }
 0x3c6   :  { %949 = vsyncpa [#allocation4], 1 }

</bundles_post_ra>
